<compile_context>
chip_gen: v7x
topology: tpu7x:2x2x1
jax: 0.10.0
libtpu: 0.0.40
codegen_flags: <defaults>
</compile_context>

<pallas_src>
import jax
import jax.numpy as jnp
from jax.experimental import pallas as pl
from jax.experimental.pallas import tpu as pltpu


def _round_up(n, m):
    return ((n + m - 1) // m) * m


# -----------------------------------------------------------------------------
# Kernel: fully unrolled padded MLP.
#   refs = (x, w_0..w_{L-1}, b_0..b_{L-1}, o)
#     x   : (Bt, Kp_0)      f32 activation tile
#     w_j : (Kp_j, Np_j)    bf16 per-layer padded weight (Kp_{j+1} == Np_j)
#     b_j : (1, Np_j)       f32 per-layer padded bias
#     o   : (Bt, Np_{L-1})  f32 output tile
# Layers 0..L-2 are followed by ReLU; layer L-1 (fc_out) is not.
# -----------------------------------------------------------------------------
def _make_mlp_kernel(num_layers):
    def kernel(*refs):
        x_ref = refs[0]
        w_refs = refs[1:1 + num_layers]
        b_refs = refs[1 + num_layers:1 + 2 * num_layers]
        o_ref = refs[1 + 2 * num_layers]

        h = x_ref[...]                                   # f32
        for j in range(num_layers):
            y = jnp.dot(h.astype(jnp.bfloat16), w_refs[j][...],
                        preferred_element_type=jnp.float32)
            y = y + b_refs[j][...]                       # f32 bias add
            h = jnp.maximum(y, 0.0) if j < num_layers - 1 else y
        o_ref[...] = h.astype(o_ref.dtype)

    return kernel


# -----------------------------------------------------------------------------
# Parameter init (mimics torch.nn.Linear default init, then * weight_scale)
# -----------------------------------------------------------------------------
def _init_linear(key, fan_in, fan_out, weight_scale):
    kw, kb = jax.random.split(key)
    bound = 1.0 / jnp.sqrt(jnp.float32(fan_in))
    # Stored as (in, out) = transpose of torch's (out, in).
    w = jax.random.uniform(kw, (fan_in, fan_out), jnp.float32, -bound, bound)
    b = jax.random.uniform(kb, (1, fan_out), jnp.float32, -bound, bound)
    return w * weight_scale, b * weight_scale


def init_rnd_prior_params(key, layers, dim_inputs, dim_output, weight_scale):
    params = {"emb": [], "fc": [], "out": None}
    if isinstance(dim_inputs, (list, tuple)):
        for d in dim_inputs:
            key, sub = jax.random.split(key)
            params["emb"].append(_init_linear(sub, d, 64, weight_scale))
        curr = 64 * len(dim_inputs)
    else:
        curr = dim_inputs
    for out_dim in layers:
        key, sub = jax.random.split(key)
        params["fc"].append(_init_linear(sub, curr, out_dim, weight_scale))
        curr = out_dim
    key, sub = jax.random.split(key)
    params["out"] = _init_linear(sub, curr, dim_output, weight_scale)
    return params


# -----------------------------------------------------------------------------
# One-time packing: fuse the embedders into ONE block-diagonal matmul and pad
# each layer individually to 128-lane multiples.  Weights are stored in bf16
# (MXU-native), biases stay f32.  Zero padding keeps the math exact: padded K
# rows / N columns are zero and padded bias lanes are zero, so padded lanes
# stay exactly zero through the whole stack and are sliced off at the end.
# -----------------------------------------------------------------------------
def pack_rnd_prior_params(params):
    emb, fc = params["emb"], params["fc"]
    w_out, b_out = params["out"]

    mats = []
    if emb:
        d_ins = [w.shape[0] for w, _ in emb]
        d_in_total = sum(d_ins)
        n_out = 64 * len(emb)
        w_bd = jnp.zeros((d_in_total, n_out), jnp.float32)
        r = 0
        for i, (w, _) in enumerate(emb):
            w_bd = w_bd.at[r:r + w.shape[0], 64 * i:64 * (i + 1)].set(w)
            r += w.shape[0]
        b_cat = jnp.concatenate([b for _, b in emb], axis=-1)   # (1, 64*E)
        mats.append((w_bd, b_cat))
    mats.extend(fc)
    mats.append((w_out, b_out))

    Ws, bs = [], []
    for w, b in mats:
        kp = _round_up(w.shape[0], 128)
        npad = _round_up(w.shape[1], 128)
        w_p = jnp.zeros((kp, npad), jnp.bfloat16)
        w_p = w_p.at[:w.shape[0], :w.shape[1]].set(w.astype(jnp.bfloat16))
        b_p = jnp.zeros((1, npad), jnp.float32).at[:, :b.shape[1]].set(b)
        Ws.append(w_p)
        bs.append(b_p)

    weight_bytes = sum(int(w.size) * 2 for w in Ws) + \
        sum(int(b.size) * 4 for b in bs)

    return {
        "Ws": Ws,
        "bs": bs,
        "num_layers": len(mats),
        "k_in_pad": Ws[0].shape[0],
        "n_out_pad": Ws[-1].shape[1],
        "d_in": mats[0][0].shape[0],
        "dim_out": w_out.shape[1],
        "is_list_input": bool(emb),
        "weight_bytes": weight_bytes,
    }


# -----------------------------------------------------------------------------
# Forward wrapper
# -----------------------------------------------------------------------------
def rnd_prior_forward(packed, x, *, batch_tile=256):
    """`x` is a list of (B, d_i) arrays iff the module was built with list
    dim_inputs (enforced), otherwise a single (B, d) array."""
    if isinstance(x, (list, tuple)):
        assert packed["is_list_input"], (
            "params were built with non-list dim_inputs but x is a list")
        x_cat = jnp.concatenate([xi.astype(jnp.float32) for xi in x], axis=-1)
    else:
        assert not packed["is_list_input"], (
            "params were built with list dim_inputs but x is not a list")
        x_cat = x.astype(jnp.float32)

    batch, d_in = x_cat.shape
    assert d_in == packed["d_in"]

    k_in_pad = packed["k_in_pad"]
    n_out_pad = packed["n_out_pad"]
    num_layers = packed["num_layers"]
    Ws, bs = packed["Ws"], packed["bs"]

    # Lane-pad the input only (one fused pad pass).  The batch axis stays
    # ragged; the cdiv grid's last partial block is handled by Pallas.
    if d_in < k_in_pad:
        x_p = jnp.pad(x_cat, ((0, 0), (0, k_in_pad - d_in)))
    else:
        x_p = x_cat

    kernel = _make_mlp_kernel(num_layers)
    out_shape = jax.ShapeDtypeStruct((batch, n_out_pad), jnp.float32)
    vmem_whole = pl.BlockSpec(memory_space=pltpu.MemorySpace.VMEM)

    use_grid = batch > batch_tile

    if not use_grid:
        # Gridless: everything resident in VMEM, single invocation, no
        # pipeline scaffolding.
        y_p = pl.pallas_call(
            kernel,
            out_shape=out_shape,
            in_specs=[vmem_whole] * (1 + 2 * num_layers),
            out_specs=vmem_whole,
        )(x_p, *Ws, *bs)
    else:
        # VMEM budget (sized for v7x's smaller VMEM): weights are a single
        # resident copy (memory_space=VMEM, no double buffering); activation
        # in/out tiles are pipelined (2 buffers each).
        def act_bytes(t):
            return 2 * t * (k_in_pad + n_out_pad) * 4

        budget = 24 * 1024 * 1024
        tile = max(8, _round_up(min(batch_tile, batch), 8))
        while tile > 128 and packed["weight_bytes"] + act_bytes(tile) > budget:
            tile = max(128, _round_up(tile // 2, 8))

        grid = (pl.cdiv(batch, tile),)

        cp_kwargs = dict(dimension_semantics=("parallel",))
        need = packed["weight_bytes"] + act_bytes(tile) + (4 << 20)
        if need > (32 << 20):
            cp_kwargs["vmem_limit_bytes"] = min(need, 64 << 20)

        y_p = pl.pallas_call(
            kernel,
            grid=grid,
            in_specs=[pl.BlockSpec((tile, k_in_pad), lambda i: (i, 0))]
                     + [vmem_whole] * (2 * num_layers),
            out_specs=pl.BlockSpec((tile, n_out_pad), lambda i: (i, 0)),
            out_shape=out_shape,
            compiler_params=pltpu.CompilerParams(**cp_kwargs),
        )(x_p, *Ws, *bs)

    return y_p[:batch, :packed["dim_out"]]


# -----------------------------------------------------------------------------
# Pure-JAX references
# -----------------------------------------------------------------------------
def rnd_prior_forward_ref(params, x):
    """Mirrors the PyTorch forward exactly (f32 weights)."""
    if isinstance(x, (list, tuple)):
        hs = [xi @ w + b for xi, (w, b) in zip(x, params["emb"])]
        h = jax.nn.relu(jnp.concatenate(hs, axis=-1))
    else:
        h = x
    for w, b in params["fc"]:
        h = jax.nn.relu(h @ w + b)
    w, b = params["out"]
    return h @ w + b


def rnd_prior_forward_mirror(packed, x):
    """Mirrors the kernel's numerics (bf16 MXU operands, f32 accumulation)."""
    if isinstance(x, (list, tuple)):
        x_cat = jnp.concatenate([xi.astype(jnp.float32) for xi in x], axis=-1)
    else:
        x_cat = x.astype(jnp.float32)
    h = jnp.pad(x_cat, ((0, 0), (0, packed["k_in_pad"] - x_cat.shape[1])))
    L = packed["num_layers"]
    for j in range(L):
        y = jnp.dot(h.astype(jnp.bfloat16), packed["Ws"][j],
                    preferred_element_type=jnp.float32) + packed["bs"][j]
        h = jnp.maximum(y, 0.0) if j < L - 1 else y
    return h[:, :packed["dim_out"]]


# -----------------------------------------------------------------------------
if __name__ == "__main__":
    key = jax.random.PRNGKey(0)

    # ---- list-style dim_inputs (fused block-diagonal embedder path) --------
    dim_inputs = [12, 20]
    layers = [32, 32]
    dim_output = 16
    weight_scale = 2.0
    batch = 8

    key, pkey, x0k, x1k = jax.random.split(key, 4)
    params = init_rnd_prior_params(pkey, layers, dim_inputs, dim_output,
                                   weight_scale)
    packed = pack_rnd_prior_params(params)

    xs = [
        jax.random.normal(x0k, (batch, dim_inputs[0]), jnp.float32),
        jax.random.normal(x1k, (batch, dim_inputs[1]), jnp.float32),
    ]

    # Small-batch (gridless) path.
    y = jax.block_until_ready(rnd_prior_forward(packed, xs))
    assert y.shape == (batch, dim_output)
    y_mirror = rnd_prior_forward_mirror(packed, xs)
    y_ref = rnd_prior_forward_ref(params, xs)
    assert jnp.allclose(y, y_mirror, atol=5e-3, rtol=5e-3), \
        "mismatch vs bf16 mirror (gridless)"
    assert jnp.allclose(y, y_ref, atol=0.15, rtol=0.05), \
        "mismatch vs f32 reference (gridless)"

    # Large-batch (batch-tiled, parallel grid, ragged last block) path.
    key, xa, xb = jax.random.split(key, 3)
    big = 300
    xs_big = [
        jax.random.normal(xa, (big, dim_inputs[0]), jnp.float32),
        jax.random.normal(xb, (big, dim_inputs[1]), jnp.float32),
    ]
    y_big = jax.block_until_ready(
        rnd_prior_forward(packed, xs_big, batch_tile=128))
    assert y_big.shape == (big, dim_output)
    y_big_mirror = rnd_prior_forward_mirror(packed, xs_big)
    y_big_ref = rnd_prior_forward_ref(params, xs_big)
    assert jnp.allclose(y_big, y_big_mirror, atol=5e-3, rtol=5e-3), \
        "mismatch vs bf16 mirror (batched)"
    assert jnp.allclose(y_big, y_big_ref, atol=0.15, rtol=0.05), \
        "mismatch vs f32 reference (batched)"

    # ---- non-list dim_inputs path (no embedders) ----------------------------
    key, pkey2, xk2 = jax.random.split(key, 3)
    params2 = init_rnd_prior_params(pkey2, [32], 24, 8, weight_scale)
    packed2 = pack_rnd_prior_params(params2)
    x_single = jax.random.normal(xk2, (8, 24), jnp.float32)
    y2 = jax.block_until_ready(rnd_prior_forward(packed2, x_single))
    assert y2.shape == (8, 8)
    assert jnp.allclose(y2, rnd_prior_forward_mirror(packed2, x_single),
                        atol=5e-3, rtol=5e-3), "mismatch (non-list input)"
    assert jnp.allclose(y2, rnd_prior_forward_ref(params2, x_single),
                        atol=0.15, rtol=0.05), "mismatch (non-list input, f32)"

    print("KERNEL_OK")
</pallas_src>

<mosaic_0001>
module attributes {stable_mosaic.version = 11 : i64} {
  func.func @kernel(%arg0: memref<8x128xf32, #tpu.memory_space<vmem>>, %arg1: memref<128x128xbf16, #tpu.memory_space<vmem>>, %arg2: memref<128x128xbf16, #tpu.memory_space<vmem>>, %arg3: memref<128x128xbf16, #tpu.memory_space<vmem>>, %arg4: memref<128x128xbf16, #tpu.memory_space<vmem>>, %arg5: memref<1x128xf32, #tpu.memory_space<vmem>>, %arg6: memref<1x128xf32, #tpu.memory_space<vmem>>, %arg7: memref<1x128xf32, #tpu.memory_space<vmem>>, %arg8: memref<1x128xf32, #tpu.memory_space<vmem>>, %arg9: memref<8x128xf32, #tpu.memory_space<vmem>>) attributes {dimension_semantics = [], scalar_prefetch = 0 : i64, scratch_operands = 0 : i64, tpu.core_type = #tpu.core_type<tc>} {
    %c0 = arith.constant 0 : index
    %c0_0 = arith.constant 0 : index
    %0 = vector.load %arg0[%c0, %c0_0] : memref<8x128xf32, #tpu.memory_space<vmem>>, vector<8x128xf32>
    %1 = arith.truncf %0 : vector<8x128xf32> to vector<8x128xbf16>
    %c0_1 = arith.constant 0 : index
    %c0_2 = arith.constant 0 : index
    %2 = vector.load %arg1[%c0_1, %c0_2] : memref<128x128xbf16, #tpu.memory_space<vmem>>, vector<128x128xbf16>
    %cst = arith.constant dense<0.000000e+00> : vector<8x128xf32>
    %3 = tpu.matmul %1, %2, %cst {dimension_numbers = #tpu.dot_dimension_numbers<[1], [0], [0], [1], [0, 0, 1, 1], [], []>} : vector<8x128xbf16>, vector<128x128xbf16>, vector<8x128xf32> -> vector<8x128xf32>
    %c0_3 = arith.constant 0 : index
    %c0_4 = arith.constant 0 : index
    %4 = vector.load %arg5[%c0_3, %c0_4] : memref<1x128xf32, #tpu.memory_space<vmem>>, vector<1x128xf32>
    %5 = vector.broadcast %4 : vector<1x128xf32> to vector<8x128xf32>
    %6 = arith.addf %3, %5 : vector<8x128xf32>
    %cst_5 = arith.constant 0.000000e+00 : f32
    %7 = vector.broadcast %cst_5 : f32 to vector<8x128xf32>
    %8 = arith.maximumf %6, %7 : vector<8x128xf32>
    %9 = arith.truncf %8 : vector<8x128xf32> to vector<8x128xbf16>
    %c0_6 = arith.constant 0 : index
    %c0_7 = arith.constant 0 : index
    %10 = vector.load %arg2[%c0_6, %c0_7] : memref<128x128xbf16, #tpu.memory_space<vmem>>, vector<128x128xbf16>
    %cst_8 = arith.constant dense<0.000000e+00> : vector<8x128xf32>
    %11 = tpu.matmul %9, %10, %cst_8 {dimension_numbers = #tpu.dot_dimension_numbers<[1], [0], [0], [1], [0, 0, 1, 1], [], []>} : vector<8x128xbf16>, vector<128x128xbf16>, vector<8x128xf32> -> vector<8x128xf32>
    %c0_9 = arith.constant 0 : index
    %c0_10 = arith.constant 0 : index
    %12 = vector.load %arg6[%c0_9, %c0_10] : memref<1x128xf32, #tpu.memory_space<vmem>>, vector<1x128xf32>
    %13 = vector.broadcast %12 : vector<1x128xf32> to vector<8x128xf32>
    %14 = arith.addf %11, %13 : vector<8x128xf32>
    %cst_11 = arith.constant 0.000000e+00 : f32
    %15 = vector.broadcast %cst_11 : f32 to vector<8x128xf32>
    %16 = arith.maximumf %14, %15 : vector<8x128xf32>
    %17 = arith.truncf %16 : vector<8x128xf32> to vector<8x128xbf16>
    %c0_12 = arith.constant 0 : index
    %c0_13 = arith.constant 0 : index
    %18 = vector.load %arg3[%c0_12, %c0_13] : memref<128x128xbf16, #tpu.memory_space<vmem>>, vector<128x128xbf16>
    %cst_14 = arith.constant dense<0.000000e+00> : vector<8x128xf32>
    %19 = tpu.matmul %17, %18, %cst_14 {dimension_numbers = #tpu.dot_dimension_numbers<[1], [0], [0], [1], [0, 0, 1, 1], [], []>} : vector<8x128xbf16>, vector<128x128xbf16>, vector<8x128xf32> -> vector<8x128xf32>
    %c0_15 = arith.constant 0 : index
    %c0_16 = arith.constant 0 : index
    %20 = vector.load %arg7[%c0_15, %c0_16] : memref<1x128xf32, #tpu.memory_space<vmem>>, vector<1x128xf32>
    %21 = vector.broadcast %20 : vector<1x128xf32> to vector<8x128xf32>
    %22 = arith.addf %19, %21 : vector<8x128xf32>
    %cst_17 = arith.constant 0.000000e+00 : f32
    %23 = vector.broadcast %cst_17 : f32 to vector<8x128xf32>
    %24 = arith.maximumf %22, %23 : vector<8x128xf32>
    %25 = arith.truncf %24 : vector<8x128xf32> to vector<8x128xbf16>
    %c0_18 = arith.constant 0 : index
    %c0_19 = arith.constant 0 : index
    %26 = vector.load %arg4[%c0_18, %c0_19] : memref<128x128xbf16, #tpu.memory_space<vmem>>, vector<128x128xbf16>
    %cst_20 = arith.constant dense<0.000000e+00> : vector<8x128xf32>
    %27 = tpu.matmul %25, %26, %cst_20 {dimension_numbers = #tpu.dot_dimension_numbers<[1], [0], [0], [1], [0, 0, 1, 1], [], []>} : vector<8x128xbf16>, vector<128x128xbf16>, vector<8x128xf32> -> vector<8x128xf32>
    %c0_21 = arith.constant 0 : index
    %c0_22 = arith.constant 0 : index
    %28 = vector.load %arg8[%c0_21, %c0_22] : memref<1x128xf32, #tpu.memory_space<vmem>>, vector<1x128xf32>
    %29 = vector.broadcast %28 : vector<1x128xf32> to vector<8x128xf32>
    %30 = arith.addf %27, %29 : vector<8x128xf32>
    %c0_23 = arith.constant 0 : index
    %c0_24 = arith.constant 0 : index
    %31 = vector.load %arg9[%c0_23, %c0_24] : memref<8x128xf32, #tpu.memory_space<vmem>>, vector<8x128xf32>
    tpu.vector_store %arg9[%c0_23, %c0_24], %30 {strides = array<i32>} : memref<8x128xf32, #tpu.memory_space<vmem>>, vector<8x128xf32>,
    return
  }
}

</mosaic_0001>

<bundles_post_ra>
// kernel: tpu_custom_call.1
= control target key start
LH: loop header
LB: loop body
LE: loop exit
PB: predicated region body
PF: predicated region fallthrough
CT: control target
= control target key end

     0   :  { %14 = vsyncpa [#allocation3], 0  ;;  %s1100_s0 = inlined_call_operand.hbm [shape: f32[8,128], index: 0, kind: input, shape index: {}]   ;;  %s1101_s1 = inlined_call_operand.hbm [shape: bf16[128,128], index: 1, kind: input, shape index: {}]   ;;  %s1102_s2 = inlined_call_operand.hbm [shape: bf16[128,128], index: 2, kind: input, shape index: {}]   ;;  %s1103_s3 = inlined_call_operand.hbm [shape: bf16[128,128], index: 3, kind: input, shape index: {}]   ;;  %s1104_s4 = inlined_call_operand.hbm [shape: bf16[128,128], index: 4, kind: input, shape index: {}]   ;;  %s1105_s5 = inlined_call_operand.vmem [shape: f32[1,128], index: 5, kind: input, shape index: {}]   ;;  %s1106_s6 = inlined_call_operand.vmem [shape: f32[1,128], index: 6, kind: input, shape index: {}]   ;;  %s1107_s7 = inlined_call_operand.vmem [shape: f32[1,128], index: 7, kind: input, shape index: {}]   ;;  %s1108_s8 = inlined_call_operand.vmem [shape: f32[1,128], index: 8, kind: input, shape index: {}]   ;;  %s1109_s9 = inlined_call_operand.hbm [shape: f32[8,128], index: 9, kind: output, shape index: {}]  }
   0x1   :  { %15 = vsyncpa [#allocation6], 0 }
   0x2   :  { %16 = vsyncpa [#allocation9], 0 }
   0x3   :  { %17 = vsyncpa [#allocation4], 0  ;;  %s904_s30 = smov [#allocation5]   ;;  %s764_s13 = scalar_lea.hbm %s1101_s1, 1024 }
   0x4   :  { %s33_s10 = sshll.u32 %s904_s30, 4  ;;  %p765_p0 = scmp.ne.s32.totalorder %s1101_s1, %s764_s13  ;;  %s34_s10 = int_to_ptr.vmem [resolvable:$true] %s33_s10 }
   0x5   :  { %p768_p1 = scmp.lt.u32.totalorder %s764_s13, %s1101_s1 }
   0x7   :  { %p770_p2 = pnand %p768_p1, %p765_p0 }
   0x9   :  { %773 = shalt.err (!%p770_p2)
}
   0xa   :  { %s774_s18 = scalar_lea.vmem %s34_s10, 1024  ;;  %p779_p4 = scmp.lt.s32.totalorder %s34_s10, %s34_s10 }
   0xb   :  { %p775_p3 = scmp.ne.s32.totalorder %s34_s10, %s774_s18  ;;  %p780_p5 = scmp.lt.s32.totalorder %s774_s18, %s774_s18 }
   0xd   :  { %p781_p6 = por %p780_p5, %p779_p4 }
   0xf   :  { %p782_p7 = pnand %p781_p6, %p775_p3 }
  0x11   :  { %785 = shalt.err (!%p782_p7)
}
  0x12   :  { %s905_s19 = smov 64   ;;  %s906_s20 = smov 4  }
  0x13   :  { %39 = dma.hbm_to_vmem [thread:$0]  %s1101_s1, 1024, %s34_s10, [#allocation6], %s905_s19, %s905_s19, %s906_s20  }
  0x14   :  { %s907_s23 = smov [#allocation8]   ;;  %s908_s25 = smov [#allocation2]  }
  0x15   :  { %s57_s24 = sshll.u32 %s907_s23, 4  ;;  %s24_s26 = sshll.u32 %s908_s25, 4  ;;  %s58_s24 = int_to_ptr.vmem [resolvable:$true] %s57_s24  ;;  %s25_s26 = int_to_ptr.vmem [resolvable:$true] %s24_s26 }
  0x16   :  { %s786_s29 = scalar_lea.hbm %s1103_s3, 1024 }
  0x17   :  { %p787_p8 = scmp.ne.s32.totalorder %s1103_s3, %s786_s29  ;;  %p790_p9 = scmp.lt.u32.totalorder %s786_s29, %s1103_s3 }
  0x19   :  { %p792_p10 = pnand %p790_p9, %p787_p8 }
  0x1b   :  { %795 = shalt.err (!%p792_p10)
}
  0x1c   :  { %s796_s1 = scalar_lea.vmem %s58_s24, 1024  ;;  %p801_p12 = scmp.lt.s32.totalorder %s58_s24, %s58_s24 }
  0x1d   :  { %p797_p11 = scmp.ne.s32.totalorder %s58_s24, %s796_s1  ;;  %p802_p13 = scmp.lt.s32.totalorder %s796_s1, %s796_s1 }
  0x1f   :  { %p803_p0 = por %p802_p13, %p801_p12 }
  0x21   :  { %p804_p1 = pnand %p803_p0, %p797_p11 }
  0x23   :  { %807 = shalt.err (!%p804_p1)
}
  0x24   :  { %63 = dma.hbm_to_vmem [thread:$0]  %s1103_s3, 1024, %s58_s24, [#allocation9], %s905_s19, %s905_s19, %s906_s20  }
  0x25   :  { %s808_s17 = scalar_lea.hbm %s1100_s0, 128 }
  0x26   :  { %p809_p2 = scmp.ne.s32.totalorder %s1100_s0, %s808_s17  ;;  %p812_p3 = scmp.lt.u32.totalorder %s808_s17, %s1100_s0 }
  0x28   :  { %p814_p4 = pnand %p812_p3, %p809_p2 }
  0x2a   :  { %817 = shalt.err (!%p814_p4)
}
  0x2b   :  { %s818_s25 = scalar_lea.vmem %s25_s26, 128  ;;  %p823_p6 = scmp.lt.s32.totalorder %s25_s26, %s25_s26 }
  0x2c   :  { %p819_p5 = scmp.ne.s32.totalorder %s25_s26, %s818_s25  ;;  %p824_p7 = scmp.lt.s32.totalorder %s818_s25, %s818_s25 }
  0x2e   :  { %p825_p8 = por %p824_p7, %p823_p6 }
  0x30   :  { %p826_p9 = pnand %p825_p8, %p819_p5 }
  0x32   :  { %829 = shalt.err (!%p826_p9)
}
  0x33   :  { %27 = dma.hbm_to_vmem [thread:$0]  %s1100_s0, 128, %s25_s26, [#allocation3]  }
  0x34   :  { %s909_s27 = smov [#allocation7]   ;;  %s910_s29 = smov [#allocation10]  }
  0x35   :  { %s45_s28 = sshll.u32 %s909_s27, 4  ;;  %s69_s30 = sshll.u32 %s910_s29, 4  ;;  %s46_s28 = int_to_ptr.vmem [resolvable:$true] %s45_s28  ;;  %s70_s30 = int_to_ptr.vmem [resolvable:$true] %s69_s30 }
  0x36   :  { %s830_s13 = scalar_lea.hbm %s1102_s2, 1024 }
  0x37   :  { %p831_p10 = scmp.ne.s32.totalorder %s1102_s2, %s830_s13  ;;  %p834_p11 = scmp.lt.u32.totalorder %s830_s13, %s1102_s2 }
  0x39   :  { %p836_p12 = pnand %p834_p11, %p831_p10 }
  0x3b   :  { %839 = shalt.err (!%p836_p12)
}
  0x3c   :  { %s840_s0 = scalar_lea.vmem %s46_s28, 1024  ;;  %p845_p0 = scmp.lt.s32.totalorder %s46_s28, %s46_s28 }
  0x3d   :  { %p841_p13 = scmp.ne.s32.totalorder %s46_s28, %s840_s0  ;;  %p846_p1 = scmp.lt.s32.totalorder %s840_s0, %s840_s0 }
  0x3f   :  { %p847_p2 = por %p846_p1, %p845_p0 }
  0x41   :  { %p848_p3 = pnand %p847_p2, %p841_p13 }
  0x43   :  { %851 = shalt.err (!%p848_p3)
}
  0x44   :  { %51 = dma.hbm_to_vmem [thread:$0]  %s1102_s2, 1024, %s46_s28, [#allocation6], %s905_s19, %s905_s19, %s906_s20  }
  0x45   :  { %s852_s21 = scalar_lea.hbm %s1104_s4, 1024 }
  0x46   :  { %p853_p4 = scmp.ne.s32.totalorder %s1104_s4, %s852_s21  ;;  %p856_p5 = scmp.lt.u32.totalorder %s852_s21, %s1104_s4 }
  0x48   :  { %p858_p6 = pnand %p856_p5, %p853_p4 }
  0x4a   :  { %861 = shalt.err (!%p858_p6)
}
  0x4b   :  { %s862_s24 = scalar_lea.vmem %s70_s30, 1024  ;;  %p867_p8 = scmp.lt.s32.totalorder %s70_s30, %s70_s30 }
  0x4c   :  { %p863_p7 = scmp.ne.s32.totalorder %s70_s30, %s862_s24  ;;  %p868_p9 = scmp.lt.s32.totalorder %s862_s24, %s862_s24 }
  0x4e   :  { %p869_p10 = por %p868_p9, %p867_p8 }
  0x50   :  { %p870_p11 = pnand %p869_p10, %p863_p7 }
  0x52   :  { %873 = shalt.err (!%p870_p11)
}
  0x53   :  { %75 = dma.hbm_to_vmem [thread:$0]  %s1104_s4, 1024, %s70_s30, [#allocation9], %s905_s19, %s905_s19, %s906_s20  }
  0x54   :  { %896 = dma.done.wait [#allocation3], 128  }
  0x55   :  { %897 = vsyncadd [#allocation3], 4294967168 }
  0x56   :  { %898 = dma.done.wait [#allocation6], 2048  }
  0x57   :  { %899 = vsyncadd [#allocation6], 4294965248 }
  0x58   :  { %900 = dma.done.wait [#allocation9], 2048  }
  0x59   :  { %901 = vsyncadd [#allocation9], 4294965248  ;;  %v911_v0 = vmov 0.0   ;;  %vm912_vm0 = vmmov 0   ;;  %v732_v1 = vld [vmem:[#allocation5] sm:$0xff]   ;;  %v733_v2 = vld [vmem:[#allocation5 + $0x8] sm:$0xff]  }
  0x5a   :  { %642 = vmatprep.subr.bf16.mxu0 %v911_v0  ;;  %658 = vmatprep.mubr.msk.bf16.mxu0 %vm912_vm0, %v911_v0  ;;  %v734_v3 = vld [vmem:[#allocation5 + $0x10] sm:$0xff]   ;;  %v740_v4 = vld [vmem:[#allocation7] sm:$0xff]   ;;  %v735_v5 = vld [vmem:[#allocation5 + $0x18] sm:$0xff]   ;;  %s913_s11 = smov [#allocation11]  }
  0x5b   :  { %662 = vmatprep.subr.bf16.mxu1 %v911_v0  ;;  %678 = vmatprep.mubr.msk.bf16.mxu1 %vm912_vm0, %v911_v0  ;;  %v741_v6 = vld [vmem:[#allocation7 + $0x8] sm:$0xff]   ;;  %v736_v7 = vld [vmem:[#allocation5 + $0x20] sm:$0xff]   ;;  %v742_v8 = vld [vmem:[#allocation7 + $0x10] sm:$0xff]   ;;  %s559_s12 = sshll.u32 %s913_s11, 4  ;;  %s560_s12 = int_to_ptr.vmem [resolvable:$true] %s559_s12 }
  0x5c   :  { %643 = vmatpush3.bf16.msra.mxu0 %v732_v1  ;;  %663 = vmatpush3.bf16.msra.mxu1 %v740_v4  ;;  %v737_v9 = vld [vmem:[#allocation5 + $0x28] sm:$0xff]   ;;  %v743_v10 = vld [vmem:[#allocation7 + $0x18] sm:$0xff]   ;;  %v738_v11 = vld [vmem:[#allocation5 + $0x30] sm:$0xff]   ;;  %p879_p13 = scmp.lt.s32.totalorder %s560_s12, %s560_s12 }
  0x5d   :  { %644 = vmatprep.subr.bf16.mxu0 %v911_v0  ;;  %664 = vmatprep.subr.bf16.mxu1 %v911_v0  ;;  %v744_v12 = vld [vmem:[#allocation7 + $0x20] sm:$0xff]   ;;  %v739_v13 = vld [vmem:[#allocation5 + $0x38] sm:$0xff]   ;;  %v745_v15 = vld [vmem:[#allocation7 + $0x28] sm:$0xff]  }
  0x5e   :  { %v100_v14 = vld [vmem:[#allocation2] sm:$0xff]  ;;  %v746_v17 = vld [vmem:[#allocation7 + $0x30] sm:$0xff]   ;;  %v748_v19 = vld [vmem:[#allocation8] sm:$0xff]  }
  0x5f   :  { %v101_v16 = vpack.c.bf16 %v100_v14, %v100_v14  ;;  %v747_v18 = vld [vmem:[#allocation7 + $0x38] sm:$0xff]   ;;  %v749_v20 = vld [vmem:[#allocation8 + $0x8] sm:$0xff]   ;;  %v750_v21 = vld [vmem:[#allocation8 + $0x10] sm:$0xff]  }
  0x60   :  { %645 = vmatpush3.bf16.msra.mxu0 %v733_v2  ;;  %665 = vmatpush3.bf16.msra.mxu1 %v741_v6  ;;  %v751_v22 = vld [vmem:[#allocation8 + $0x18] sm:$0xff]   ;;  %v752_v23 = vld [vmem:[#allocation8 + $0x20] sm:$0xff]   ;;  %v753_v24 = vld [vmem:[#allocation8 + $0x28] sm:$0xff]  }
  0x61   :  { %646 = vmatprep.subr.bf16.mxu0 %v911_v0  ;;  %666 = vmatprep.subr.bf16.mxu1 %v911_v0  ;;  %v570_v25 = vld [vmem:[%s1105_s5] ss:$0 sm:$0xff]  ;;  %v754_v33 = vld [vmem:[#allocation8 + $0x30] sm:$0xff]   ;;  %v756_v35 = vld [vmem:[#allocation10] sm:$0xff]  }
  0x62   :  { %v755_v34 = vld [vmem:[#allocation8 + $0x38] sm:$0xff]   ;;  %v757_v36 = vld [vmem:[#allocation10 + $0x8] sm:$0xff]   ;;  %v758_v37 = vld [vmem:[#allocation10 + $0x10] sm:$0xff]  }
  0x63   :  { %v759_v38 = vld [vmem:[#allocation10 + $0x18] sm:$0xff]   ;;  %v760_v39 = vld [vmem:[#allocation10 + $0x20] sm:$0xff]   ;;  %v761_v40 = vld [vmem:[#allocation10 + $0x28] sm:$0xff]  }
  0x64   :  { %647 = vmatpush3.bf16.msra.mxu0 %v734_v3  ;;  %667 = vmatpush3.bf16.msra.mxu1 %v742_v8  ;;  %v579_v41 = vld [vmem:[%s1106_s6] ss:$0 sm:$0xff]  ;;  %v762_v49 = vld [vmem:[#allocation10 + $0x30] sm:$0xff]  }
  0x65   :  { %648 = vmatprep.subr.bf16.mxu0 %v911_v0  ;;  %668 = vmatprep.subr.bf16.mxu1 %v911_v0  ;;  %v763_v50 = vld [vmem:[#allocation10 + $0x38] sm:$0xff]  }
  0x66   :  { %v588_v51 = vld [vmem:[%s1107_s7] ss:$0 sm:$0xff]  ;;  %s874_s7 = scalar_lea.vmem %s560_s12, 128 }
  0x67   :  { %v597_v59 = vld [vmem:[%s1108_s8] ss:$0 sm:$0xff]  ;;  %p875_p12 = scmp.ne.s32.totalorder %s560_s12, %s874_s7  ;;  %p880_p0 = scmp.lt.s32.totalorder %s874_s7, %s874_s7 }
  0x68   :  { %649 = vmatpush3.bf16.msra.mxu0 %v735_v5  ;;  %669 = vmatpush3.bf16.msra.mxu1 %v743_v10 }
  0x69   :  { %650 = vmatprep.subr.bf16.mxu0 %v911_v0  ;;  %670 = vmatprep.subr.bf16.mxu1 %v911_v0  ;;  %p881_p1 = por %p880_p0, %p879_p13 }
  0x6b   :  { %p882_p2 = pnand %p881_p1, %p875_p12 }
  0x6c   :  { %651 = vmatpush3.bf16.msra.mxu0 %v736_v7  ;;  %671 = vmatpush3.bf16.msra.mxu1 %v744_v12 }
  0x6d   :  { %652 = vmatprep.subr.bf16.mxu0 %v911_v0  ;;  %672 = vmatprep.subr.bf16.mxu1 %v911_v0 }
  0x70   :  { %653 = vmatpush3.bf16.msra.mxu0 %v737_v9  ;;  %673 = vmatpush3.bf16.msra.mxu1 %v745_v15 }
  0x71   :  { %654 = vmatprep.subr.bf16.mxu0 %v911_v0  ;;  %674 = vmatprep.subr.bf16.mxu1 %v911_v0 }
  0x74   :  { %655 = vmatpush3.bf16.msra.mxu0 %v738_v11  ;;  %675 = vmatpush3.bf16.msra.mxu1 %v746_v17 }
  0x75   :  { %656 = vmatprep.subr.bf16.mxu0 %v911_v0  ;;  %676 = vmatprep.subr.bf16.mxu1 %v911_v0 }
  0x78   :  { %657 = vmatpush3.bf16.msra.mxu0 %v739_v13  ;;  %677 = vmatpush3.bf16.msra.mxu1 %v747_v18 }
  0x79   :  { %682 = vmatprep.subr.bf16.mxu0 %v911_v0  ;;  %702 = vmatprep.subr.bf16.mxu1 %v911_v0 }
  0x7b   :  { %659 = vmatmul.mubr.bf16.vlgmr.msra.gmra.mrb[0].mxu0 %v101_v16 }
  0x7c   :  { %698 = vmatprep.mubr.msk.bf16.mxu0 %vm912_vm0, %v911_v0  ;;  %683 = vmatpush3.bf16.msra.mxu0 %v748_v19 }
  0x7d   :  { %684 = vmatprep.subr.bf16.mxu0 %v911_v0 }
  0x80   :  { %685 = vmatpush3.bf16.msra.mxu0 %v749_v20 }
  0x81   :  { %686 = vmatprep.subr.bf16.mxu0 %v911_v0 }
  0x84   :  { %687 = vmatpush3.bf16.msra.mxu0 %v750_v21 }
  0x85   :  { %688 = vmatprep.subr.bf16.mxu0 %v911_v0 }
  0x88   :  { %689 = vmatpush3.bf16.msra.mxu0 %v751_v22 }
  0x89   :  { %690 = vmatprep.subr.bf16.mxu0 %v911_v0 }
  0x8c   :  { %691 = vmatpush3.bf16.msra.mxu0 %v752_v23 }
  0x8d   :  { %692 = vmatprep.subr.bf16.mxu0 %v911_v0 }
  0x90   :  { %693 = vmatpush3.bf16.msra.mxu0 %v753_v24 }
  0x91   :  { %694 = vmatprep.subr.bf16.mxu0 %v911_v0 }
  0x94   :  { %695 = vmatpush3.bf16.msra.mxu0 %v754_v33 }
  0x95   :  { %696 = vmatprep.subr.bf16.mxu0 %v911_v0 }
  0x98   :  { %697 = vmatpush3.bf16.msra.mxu0 %v755_v34 }
 0x14e   :  { %v207_v26 = vpop.f32.mrb[0].mxu0 }
 0x14f   :  { %v208_v27 = vadd.f32 %v570_v25, %v207_v26  ;;  %v660_v28 = vpop.f32.mrb[1].mxu0 }
 0x150   :  { %v210_v29 = vpop.f32.mrb[2].mxu0 }
 0x151   :  { %v213_v30 = vmax.f32 %v208_v27, 0.0  ;;  %v661_v31 = vpop.f32.mrb[3].mxu0 }
 0x153   :  { %v214_v32 = vpack.c.bf16 %v213_v30, %v213_v30 }
 0x155   :  { %679 = vmatmul.mubr.bf16.vlgmr.msra.gmra.mrb[0].mxu1 %v214_v32 }
 0x156   :  { %718 = vmatprep.mubr.msk.bf16.mxu1 %vm912_vm0, %v911_v0  ;;  %703 = vmatpush3.bf16.msra.mxu1 %v756_v35 }
 0x157   :  { %704 = vmatprep.subr.bf16.mxu1 %v911_v0 }
 0x15a   :  { %705 = vmatpush3.bf16.msra.mxu1 %v757_v36 }
 0x15b   :  { %706 = vmatprep.subr.bf16.mxu1 %v911_v0 }
 0x15e   :  { %707 = vmatpush3.bf16.msra.mxu1 %v758_v37 }
 0x15f   :  { %708 = vmatprep.subr.bf16.mxu1 %v911_v0 }
 0x162   :  { %709 = vmatpush3.bf16.msra.mxu1 %v759_v38 }
 0x163   :  { %710 = vmatprep.subr.bf16.mxu1 %v911_v0 }
 0x166   :  { %711 = vmatpush3.bf16.msra.mxu1 %v760_v39 }
 0x167   :  { %712 = vmatprep.subr.bf16.mxu1 %v911_v0 }
 0x16a   :  { %713 = vmatpush3.bf16.msra.mxu1 %v761_v40 }
 0x16b   :  { %714 = vmatprep.subr.bf16.mxu1 %v911_v0 }
 0x16e   :  { %715 = vmatpush3.bf16.msra.mxu1 %v762_v49 }
 0x16f   :  { %716 = vmatprep.subr.bf16.mxu1 %v911_v0 }
 0x172   :  { %717 = vmatpush3.bf16.msra.mxu1 %v763_v50 }
 0x228   :  { %v320_v42 = vpop.f32.mrb[0].mxu1 }
 0x229   :  { %v321_v43 = vadd.f32 %v579_v41, %v320_v42  ;;  %v680_v44 = vpop.f32.mrb[1].mxu1 }
 0x22a   :  { %v323_v45 = vpop.f32.mrb[2].mxu1 }
 0x22b   :  { %v326_v46 = vmax.f32 %v321_v43, 0.0  ;;  %v681_v47 = vpop.f32.mrb[3].mxu1 }
 0x22d   :  { %v327_v48 = vpack.c.bf16 %v326_v46, %v326_v46 }
 0x22f   :  { %699 = vmatmul.mubr.bf16.vlgmr.msra.gmra.mrb[4].mxu0 %v327_v48 }
 0x302   :  { %v433_v52 = vpop.f32.mrb[4].mxu0 }
 0x303   :  { %v434_v53 = vadd.f32 %v588_v51, %v433_v52  ;;  %v700_v54 = vpop.f32.mrb[5].mxu0 }
 0x304   :  { %v436_v55 = vpop.f32.mrb[6].mxu0 }
 0x305   :  { %v439_v56 = vmax.f32 %v434_v53, 0.0  ;;  %v701_v57 = vpop.f32.mrb[7].mxu0 }
 0x307   :  { %v440_v58 = vpack.c.bf16 %v439_v56, %v439_v56 }
 0x309   :  { %719 = vmatmul.mubr.bf16.vlgmr.msra.gmra.mrb[4].mxu1 %v440_v58 }
 0x3dc   :  { %v546_v60 = vpop.f32.mrb[4].mxu1 }
 0x3dd   :  { %v547_v61 = vadd.f32 %v597_v59, %v546_v60  ;;  %v720_v62 = vpop.f32.mrb[5].mxu1 }
 0x3de   :  { %v549_v63 = vpop.f32.mrb[6].mxu1 }
 0x3df   :  { %552 = vst [vmem:[#allocation11] sm:$0xff] %v547_v61  ;;  %v721_v0 = vpop.f32.mrb[7].mxu1 }
 0x3e0   :  { %885 = shalt.err (!%p882_p2)
}
 0x3e1   :  { %s886_s8 = scalar_lea.hbm %s1109_s9, 128 }
 0x3e2   :  { %p887_p3 = scmp.ne.s32.totalorder %s1109_s9, %s886_s8  ;;  %p890_p4 = scmp.lt.u32.totalorder %s886_s8, %s1109_s9 }
 0x3e4   :  { %p892_p5 = pnand %p890_p4, %p887_p3 }
 0x3e6   :  { %895 = shalt.err (!%p892_p5)
}
 0x3e7   :  { %562 = dma.vmem_to_hbm [thread:$0]  %s560_s12, 128, %s1109_s9, [#allocation4]  }
 0x3e8   :  { %902 = dma.done.wait [#allocation4], 128  }
 0x3e9   :  { %903 = vsyncadd [#allocation4], 4294967168 }
 0x3ea   :  { %566 = vsyncpa [#allocation3], 1 }
 0x3eb   :  { %567 = vsyncpa [#allocation6], 1 }
 0x3ec   :  { %568 = vsyncpa [#allocation9], 1 }
 0x3ed   :  { %569 = vsyncpa [#allocation4], 1 }

</bundles_post_ra>
